<compile_context>
chip_gen: v7x
topology: tpu7x:2x2x1
jax: 0.10.0
libtpu: 0.0.40
codegen_flags: <defaults>
</compile_context>

<pallas_src>
import numpy as np
import jax
import jax.numpy as jnp
from jax.experimental import pallas as pl
from jax.experimental.pallas import tpu as pltpu

_LANE = 128


def _round_up(v: int, m: int) -> int:
    return (v + m - 1) // m * m


# ----------------------------------------------------------------------------
# Deterministic parameter construction (mirrors TexLaplacianLoss.__init__).
# ----------------------------------------------------------------------------
def get_edge2faces(faces: np.ndarray) -> np.ndarray:
    """Port of TexLaplacianLoss.getEdge2Faces (numpy, int faces [nf, 3])."""
    faces_sorted = np.sort(faces, axis=1)
    edges_all = np.concatenate(
        (faces_sorted[:, 0:2], faces_sorted[:, 1:3], faces_sorted[:, 0:3:2])
    )
    num_edges = len(set(tuple(v) for v in edges_all))
    edge2face = -np.ones((num_edges, 2), dtype=np.int32)
    edge2idx = {}
    idx = 0
    for i, f in enumerate(faces_sorted):
        for e in [(f[0], f[1]), (f[1], f[2]), (f[0], f[2])]:
            if edge2idx.get(e) is None:
                edge2idx[e] = idx
                idx += 1
            if edge2face[edge2idx[e], 0] == -1:
                edge2face[edge2idx[e], 0] = i
            elif edge2face[edge2idx[e], 1] == -1:
                edge2face[edge2idx[e], 1] = i
    return edge2face


def build_tex_laplacian(faces: np.ndarray) -> np.ndarray:
    """Build the face-adjacency laplacian buffer (intended __init__ semantics)."""
    nf = faces.shape[0]
    texlaplacian = np.zeros([nf, nf], dtype=np.float32)
    edge2face = get_edge2faces(faces)
    # Only interior edges (both slots filled) define adjacency; boundary edges
    # keep a -1 sentinel in the reference code and are skipped here.
    valid = edge2face[:, 1] != -1
    e2f = edge2face[valid]
    texlaplacian[e2f[:, 0], e2f[:, 1]] = -1
    texlaplacian[e2f[:, 1], e2f[:, 0]] = -1
    r, c = np.diag_indices(nf)
    texlaplacian[r, c] = -texlaplacian.sum(1)
    # NOTE: a face with zero interior-edge neighbors would have diag 0 here and
    # produce inf/nan rows (same as the PyTorch reference); the grid meshes
    # used below always have diag >= 1.
    for i in range(nf):
        texlaplacian[i, :] /= texlaplacian[i, i]
    return texlaplacian


def make_grid_faces(n: int) -> np.ndarray:
    """Triangulated (n x n) vertex grid -> 2*(n-1)^2 faces (deterministic mesh)."""
    faces = []
    for r in range(n - 1):
        for c in range(n - 1):
            v00 = r * n + c
            v01 = r * n + c + 1
            v10 = (r + 1) * n + c
            v11 = (r + 1) * n + c + 1
            faces.append([v00, v01, v10])
            faces.append([v01, v11, v10])
    return np.asarray(faces, dtype=np.int32)


# ----------------------------------------------------------------------------
# Pallas kernel: row-tiled Y = L @ X with a k-accumulator, per-column
# sum-of-squares accumulated into the output block across row tiles.
# ----------------------------------------------------------------------------
def _tex_laplacian_kernel(lap_ref, x_ref, out_ref, acc_ref):
    # lap_ref: [t_nf, t_nf]  matmul dtype -- (row tile i of group g, k tile) of L
    # x_ref:   [t_nf, tn]    matmul dtype -- (k tile, lane tile j) of X
    # out_ref: [1, tn]       f32          -- per-column sum(Y^2), one block per (g, j)
    # acc_ref: [t_nf, tn]    f32 scratch  -- Y row tile accumulated over k
    i = pl.program_id(2)
    k = pl.program_id(3)
    nk = pl.num_programs(3)

    @pl.when((i == 0) & (k == 0))
    def _init_out():
        out_ref[...] = jnp.zeros_like(out_ref)

    prod = jnp.dot(lap_ref[...], x_ref[...], preferred_element_type=jnp.float32)

    @pl.when(k == 0)
    def _set_acc():
        acc_ref[...] = prod          # no zero-fill + add: saves a store pass

    @pl.when(k > 0)
    def _add_acc():
        acc_ref[...] += prod

    @pl.when(k == nk - 1)
    def _fold_rows():
        y = acc_ref[...]
        out_ref[...] += jnp.sum(y * y, axis=0, keepdims=True)


def _default_tiles():
    """Per-generation tile caps (t_nf, tn_cap, vmem_limit_bytes)."""
    try:
        info = pltpu.get_tpu_info()
        vmem_bytes = int(getattr(info, "vmem_capacity_bytes", 64 * 1024 * 1024))
    except Exception:  # be robust if the query is unavailable
        vmem_bytes = 64 * 1024 * 1024
    if vmem_bytes >= 96 * 1024 * 1024:
        # v5e / v6e class (128 MiB VMEM): wide lane tiles keep the re-streamed
        # L above the HBM roofline crossover when B*D spans many lane tiles.
        return 512, 1024, 96 * 1024 * 1024
    # v7x class (64 MiB VMEM per TC): keep the working set small.
    return 512, 512, 48 * 1024 * 1024


def make_tex_laplacian_loss(texlaplacian, *, average=False,
                            matmul_dtype=jnp.bfloat16,
                            tile_nf=None, tile_lanes=None,
                            vmem_limit_bytes=None, use_pallas=True):
    """Build a jitted loss(x) for a fixed mesh.

    The constant Laplacian is cast to `matmul_dtype` and zero-padded ONCE here
    (hoisted out of the per-step loss call).  x: [B, nf, ...] float.
    Returns [B] (or a scalar if average=True).
    """
    lap_f32 = jnp.asarray(texlaplacian, dtype=jnp.float32)
    nf = int(lap_f32.shape[0])
    assert lap_f32.shape == (nf, nf)

    d_t_nf, d_tn, d_vmem = _default_tiles()
    t_nf_cap = _round_up(max(int(tile_nf or d_t_nf), _LANE), _LANE)
    tn_cap = _round_up(max(int(tile_lanes or d_tn), _LANE), _LANE)
    vmem_limit = int(vmem_limit_bytes or d_vmem)

    # bf16 packs two rows per sublane -> 16-row padding granularity.
    row_align = 16 if jnp.dtype(matmul_dtype).itemsize <= 2 else 8
    base = _round_up(nf, row_align)

    if base <= t_nf_cap:
        t_nf, groups, nf_pad = base, 1, base              # single (row, k) tile
    else:
        t_nf = t_nf_cap
        pad_g2 = _round_up(base, 2 * t_nf)
        # Two megacore row-groups only if grouping adds <= 25% extra padding.
        groups = 2 if (pad_g2 - base) * 4 <= base else 1
        nf_pad = _round_up(base, groups * t_nf)
    n_row_tiles = nf_pad // t_nf
    rows_per_group = n_row_tiles // groups
    n_k_tiles = nf_pad // t_nf

    # Constant L: pad + cast once per mesh.  Zero padding is exact (padded
    # rows/cols of L and rows of X contribute 0 to every output).
    lap_p = jnp.pad(lap_f32, ((0, nf_pad - nf), (0, nf_pad - nf))).astype(matmul_dtype)
    esz = jnp.dtype(matmul_dtype).itemsize

    def loss_fn(x):
        b = x.shape[0]
        assert x.shape[1] == nf, f"x.shape[1]={x.shape[1]} != nf={nf}"
        d = 1
        for s in x.shape[2:]:
            d *= int(s)
        n = b * d

        run_pallas = use_pallas
        if run_pallas is None:
            # Launch-bound tiny problems: plain XLA wins (no pad/transpose/dispatch).
            run_pallas = nf_pad * _round_up(n, _LANE) >= 256 * 256
        if not run_pallas:
            y = jnp.matmul(lap_f32, x.reshape(b, nf, d).astype(jnp.float32))
            per_batch = jnp.sum(y * y, axis=(1, 2))
            return per_batch.sum() / b if average else per_batch

        # Lane tiling of the folded B*D column axis.
        n_pad = _round_up(n, _LANE)
        if n_pad <= tn_cap:
            tn = n_pad
        else:
            tn = tn_cap
            n_pad = _round_up(n, tn)
        n_lane_tiles = n_pad // tn

        # Fold batch into the lane axis: X[nf, B*D] (batch-major columns).
        # Under jit the cast/transpose/pad fuse into one copy.
        x_fold = jnp.transpose(x.reshape(b, nf, d).astype(matmul_dtype), (1, 0, 2))
        x_fold = x_fold.reshape(nf, n)
        x_p = jnp.pad(x_fold, ((0, nf_pad - nf), (0, n_pad - n)))

        grid = (groups, n_lane_tiles, rows_per_group, n_k_tiles)

        cost = pl.CostEstimate(
            flops=2 * nf_pad * nf_pad * n_pad + 2 * nf_pad * n_pad,
            transcendentals=0,
            bytes_accessed=(n_lane_tiles * nf_pad * nf_pad * esz   # L per lane tile
                            + n_row_tiles * nf_pad * n_pad * esz   # X per row tile
                            + groups * n_pad * 4),
        )

        col_sq = pl.pallas_call(
            _tex_laplacian_kernel,
            out_shape=jax.ShapeDtypeStruct((1, groups * n_pad), jnp.float32),
            grid_spec=pltpu.PrefetchScalarGridSpec(
                num_scalar_prefetch=0,
                grid=grid,
                in_specs=[
                    # Row tile (within group g) x k tile of L.
                    pl.BlockSpec((t_nf, t_nf),
                                 lambda g, j, i, k: (g * rows_per_group + i, k)),
                    # k tile x lane tile of X.
                    pl.BlockSpec((t_nf, tn), lambda g, j, i, k: (k, j)),
                ],
                # Lane-dense per-(group, lane-tile) partial sums; accumulated in
                # place across (i, k).
                out_specs=pl.BlockSpec(
                    (1, tn), lambda g, j, i, k: (0, g * n_lane_tiles + j)),
                scratch_shapes=[pltpu.VMEM((t_nf, tn), jnp.float32)],
            ),
            compiler_params=pltpu.CompilerParams(
                dimension_semantics=("parallel", "parallel",
                                     "arbitrary", "arbitrary"),
                vmem_limit_bytes=vmem_limit,
            ),
            cost_estimate=cost,
        )(lap_p, x_p)

        # Tiny wrapper-side fold: sum the group rows, drop lane padding, fold
        # per batch.
        col = col_sq.reshape(groups, n_pad).sum(axis=0)[:n]
        per_batch = col.reshape(b, d).sum(axis=-1)
        return per_batch.sum() / b if average else per_batch

    return jax.jit(loss_fn)


def tex_laplacian_loss(texlaplacian, x, average=False,
                       matmul_dtype=jnp.bfloat16, **kwargs):
    """One-off convenience wrapper.  For training loops build the loss fn once
    with make_tex_laplacian_loss (hoists the constant L cast/pad)."""
    fn = make_tex_laplacian_loss(texlaplacian, average=average,
                                 matmul_dtype=matmul_dtype, **kwargs)
    return fn(x)


# ----------------------------------------------------------------------------
# Reference (plain JAX) for verification.
# ----------------------------------------------------------------------------
def tex_laplacian_loss_ref(texlaplacian, x, average=False):
    b = x.shape[0]
    y = jnp.matmul(texlaplacian, x.reshape(b, x.shape[1], -1))
    out = jnp.sum(y ** 2, axis=(1, 2))
    if average:
        return out.sum() / b
    return out


if __name__ == "__main__":
    # --- Mesh 1: 5x5 vertex grid -> nf = 32 faces (single-tile path). --------
    faces_small = make_grid_faces(5)
    lap_small = jnp.asarray(build_tex_laplacian(faces_small))
    nf_small = faces_small.shape[0]

    key = jax.random.PRNGKey(0)
    x_small = jax.random.normal(key, (2, nf_small, 16, 3), dtype=jnp.float32)
    ref_small = tex_laplacian_loss_ref(lap_small, x_small)

    # f32 matmul path: tight check against the f32 reference.
    loss_f32 = make_tex_laplacian_loss(lap_small, matmul_dtype=jnp.float32)
    out_f32 = jax.block_until_ready(loss_f32(x_small))
    np.testing.assert_allclose(np.asarray(out_f32), np.asarray(ref_small),
                               rtol=1e-4, atol=1e-4)

    # bf16 matmul path (default, faster): looser tolerance vs f32 reference.
    loss_bf16 = make_tex_laplacian_loss(lap_small)
    out_bf16 = jax.block_until_ready(loss_bf16(x_small))
    np.testing.assert_allclose(np.asarray(out_bf16), np.asarray(ref_small),
                               rtol=3e-2, atol=1e-2)

    # average=True path.
    loss_avg = make_tex_laplacian_loss(lap_small, average=True,
                                       matmul_dtype=jnp.float32)
    ref_avg = tex_laplacian_loss_ref(lap_small, x_small, average=True)
    out_avg = jax.block_until_ready(loss_avg(x_small))
    np.testing.assert_allclose(np.asarray(out_avg), np.asarray(ref_avg),
                               rtol=1e-4, atol=1e-4)

    # --- Mesh 2: 17x17 grid -> nf = 512 faces.  Small tile overrides force the
    # multi-(group, lane-tile, row-tile, k-tile) accumulation paths that large
    # meshes hit with the default 512/1024 tiles. ------------------------------
    faces_big = make_grid_faces(17)
    lap_big = jnp.asarray(build_tex_laplacian(faces_big))
    nf_big = faces_big.shape[0]

    x_big = jax.random.normal(jax.random.PRNGKey(1), (2, nf_big, 24, 4),
                              dtype=jnp.float32)
    ref_big = tex_laplacian_loss_ref(lap_big, x_big)
    loss_big = make_tex_laplacian_loss(lap_big, matmul_dtype=jnp.float32,
                                       tile_nf=128, tile_lanes=128)
    out_big = jax.block_until_ready(loss_big(x_big))
    np.testing.assert_allclose(np.asarray(out_big), np.asarray(ref_big),
                               rtol=1e-4, atol=1e-3)

    print("KERNEL_OK")
</pallas_src>

<mosaic_0001>
module attributes {stable_mosaic.version = 11 : i64} {
  func.func @_tex_laplacian_kernel(%arg0: i32, %arg1: i32, %arg2: i32, %arg3: i32, %arg4: memref<32x32xf32, #tpu.memory_space<vmem>>, %arg5: memref<32x128xf32, #tpu.memory_space<vmem>>, %arg6: memref<1x128xf32, #tpu.memory_space<vmem>>, %arg7: memref<32x128xf32, #tpu.memory_space<vmem>>) attributes {dimension_semantics = [#tpu.dimension_semantics<parallel>, #tpu.dimension_semantics<parallel>, #tpu.dimension_semantics<arbitrary>, #tpu.dimension_semantics<arbitrary>], iteration_bounds = array<i64: 1, 1, 1, 1>, scalar_prefetch = 0 : i64, scratch_operands = 1 : i64, tpu.core_type = #tpu.core_type<tc>, window_params = [{transform_indices = @transform_0, window_bounds = array<i64: 32, 32>}, {transform_indices = @transform_1, window_bounds = array<i64: 32, 128>}, {transform_indices = @transform_2, window_bounds = array<i64: 1, 128>}]} {
    %c0_i32 = arith.constant 0 : i32
    %0 = arith.cmpi eq, %arg2, %c0_i32 : i32
    %c0_i32_0 = arith.constant 0 : i32
    %1 = arith.cmpi eq, %arg3, %c0_i32_0 : i32
    %2 = arith.andi %0, %1 : i1
    %3 = arith.extui %2 : i1 to i32
    %c0_i32_1 = arith.constant 0 : i32
    %4 = arith.cmpi ne, %3, %c0_i32_1 : i32
    scf.if %4 {
      %cst_11 = arith.constant 0.000000e+00 : f32
      %17 = vector.broadcast %cst_11 : f32 to vector<1x128xf32>
      %c0_12 = arith.constant 0 : index
      %c0_13 = arith.constant 0 : index
      %18 = vector.load %arg6[%c0_12, %c0_13] : memref<1x128xf32, #tpu.memory_space<vmem>>, vector<1x128xf32>
      tpu.vector_store %arg6[%c0_12, %c0_13], %17 {strides = array<i32>} : memref<1x128xf32, #tpu.memory_space<vmem>>, vector<1x128xf32>,
    } else {
    }
    %c0 = arith.constant 0 : index
    %c0_2 = arith.constant 0 : index
    %5 = vector.load %arg4[%c0, %c0_2] : memref<32x32xf32, #tpu.memory_space<vmem>>, vector<32x32xf32>
    %c0_3 = arith.constant 0 : index
    %c0_4 = arith.constant 0 : index
    %6 = vector.load %arg5[%c0_3, %c0_4] : memref<32x128xf32, #tpu.memory_space<vmem>>, vector<32x128xf32>
    %cst = arith.constant dense<0.000000e+00> : vector<32x128xf32>
    %7 = tpu.matmul %5, %6, %cst {dimension_numbers = #tpu.dot_dimension_numbers<[1], [0], [0], [1], [0, 0, 1, 1], [], []>} : vector<32x32xf32>, vector<32x128xf32>, vector<32x128xf32> -> vector<32x128xf32>
    %c0_i32_5 = arith.constant 0 : i32
    %8 = arith.cmpi eq, %arg3, %c0_i32_5 : i32
    %9 = arith.extui %8 : i1 to i32
    %c0_i32_6 = arith.constant 0 : i32
    %10 = arith.cmpi ne, %9, %c0_i32_6 : i32
    scf.if %10 {
      %c0_11 = arith.constant 0 : index
      %c0_12 = arith.constant 0 : index
      %17 = vector.load %arg7[%c0_11, %c0_12] : memref<32x128xf32, #tpu.memory_space<vmem>>, vector<32x128xf32>
      tpu.vector_store %arg7[%c0_11, %c0_12], %7 {strides = array<i32>} : memref<32x128xf32, #tpu.memory_space<vmem>>, vector<32x128xf32>,
    } else {
    }
    %c0_i32_7 = arith.constant 0 : i32
    %11 = arith.cmpi sgt, %arg3, %c0_i32_7 : i32
    %12 = arith.extui %11 : i1 to i32
    %c0_i32_8 = arith.constant 0 : i32
    %13 = arith.cmpi ne, %12, %c0_i32_8 : i32
    scf.if %13 {
      %c0_11 = arith.constant 0 : index
      %c0_12 = arith.constant 0 : index
      %17 = vector.load %arg7[%c0_11, %c0_12] : memref<32x128xf32, #tpu.memory_space<vmem>>, vector<32x128xf32>
      %18 = arith.addf %17, %7 : vector<32x128xf32>
      %c0_13 = arith.constant 0 : index
      %c0_14 = arith.constant 0 : index
      %19 = vector.load %arg7[%c0_13, %c0_14] : memref<32x128xf32, #tpu.memory_space<vmem>>, vector<32x128xf32>
      tpu.vector_store %arg7[%c0_13, %c0_14], %18 {strides = array<i32>} : memref<32x128xf32, #tpu.memory_space<vmem>>, vector<32x128xf32>,
    } else {
    }
    %c0_i32_9 = arith.constant 0 : i32
    %14 = arith.cmpi eq, %arg3, %c0_i32_9 : i32
    %15 = arith.extui %14 : i1 to i32
    %c0_i32_10 = arith.constant 0 : i32
    %16 = arith.cmpi ne, %15, %c0_i32_10 : i32
    scf.if %16 {
      %c0_11 = arith.constant 0 : index
      %c0_12 = arith.constant 0 : index
      %17 = vector.load %arg7[%c0_11, %c0_12] : memref<32x128xf32, #tpu.memory_space<vmem>>, vector<32x128xf32>
      %c0_13 = arith.constant 0 : index
      %c0_14 = arith.constant 0 : index
      %18 = vector.load %arg6[%c0_13, %c0_14] : memref<1x128xf32, #tpu.memory_space<vmem>>, vector<1x128xf32>
      %19 = arith.mulf %17, %17 : vector<32x128xf32>
      %cst_15 = arith.constant dense<0.000000e+00> : vector<128xf32>
      %20 = vector.multi_reduction <add>, %19, %cst_15 [0] : vector<32x128xf32> to vector<128xf32>
      %21 = vector.shape_cast %20 : vector<128xf32> to vector<1x128xf32>
      %22 = arith.addf %18, %21 : vector<1x128xf32>
      %c0_16 = arith.constant 0 : index
      %c0_17 = arith.constant 0 : index
      %23 = vector.load %arg6[%c0_16, %c0_17] : memref<1x128xf32, #tpu.memory_space<vmem>>, vector<1x128xf32>
      tpu.vector_store %arg6[%c0_16, %c0_17], %22 {strides = array<i32>} : memref<1x128xf32, #tpu.memory_space<vmem>>, vector<1x128xf32>,
    } else {
    }
    return
  }
  func.func @transform_0(%arg0: i32, %arg1: i32, %arg2: i32, %arg3: i32) -> (i32, i32) {
    %c1_i32 = arith.constant 1 : i32
    %0 = arith.muli %arg0, %c1_i32 : i32
    %1 = arith.addi %0, %arg2 : i32
    %c0_i32 = arith.constant 0 : i32
    return %1, %arg3 : i32, i32
  }
  func.func @transform_1(%arg0: i32, %arg1: i32, %arg2: i32, %arg3: i32) -> (i32, i32) {
    %c0_i32 = arith.constant 0 : i32
    return %arg3, %arg1 : i32, i32
  }
  func.func @transform_2(%arg0: i32, %arg1: i32, %arg2: i32, %arg3: i32) -> (i32, i32) {
    %c1_i32 = arith.constant 1 : i32
    %0 = arith.muli %arg0, %c1_i32 : i32
    %1 = arith.addi %0, %arg1 : i32
    %c0_i32 = arith.constant 0 : i32
    %c0_i32_0 = arith.constant 0 : i32
    return %c0_i32, %1 : i32, i32
  }
}

</mosaic_0001>

<bundles_post_ra>
// kernel: loss_fn.1
= control target key start
LH: loop header
LB: loop body
LE: loop exit
PB: predicated region body
PF: predicated region fallthrough
CT: control target
= control target key end

     0   :  { %vm57_vm0 = vcmask 261120   ;;  %v263_v10 = vmov 0.0   ;;  %s316_s1 = inlined_call_operand.vmem [shape: f32[32,128], index: 1, kind: input, shape index: {}]   ;;  %s317_s0 = inlined_call_operand.vmem [shape: f32[32,32], index: 0, kind: input, shape index: {}]   ;;  %s318_s2 = inlined_call_operand.vmem [shape: f32[1,128], index: 2, kind: output, shape index: {}]  }
   0x1   :  { %v53_v0 = vld [vmem:[%s316_s1] sm:$0xff]  ;;  %v54_v1 = vld [vmem:[%s316_s1 + $0x8] sm:$0xff]  ;;  %v55_v2 = vld [vmem:[%s316_s1 + $0x10] sm:$0xff]  ;;  %48 = vst [vmem:[%s318_s2] sm:$0x1] %v263_v10 }
   0x2   :  { %v250_v3 = vpack.c.bf16 %v54_v1, %v53_v0  ;;  %v56_v4 = vld [vmem:[%s316_s1 + $0x18] sm:$0xff]  ;;  %v49_v5 = vld [vmem:[%s317_s0] sm:$0xff]  ;;  %v51_v7 = vld [vmem:[%s317_s0 + $0x10] sm:$0xff] }
   0x3   :  { %v254_v6 = vpack.c.bf16 %v56_v4, %v55_v2  ;;  %244 = vmatprep.mubr.msk.f32.mxu0 %vm57_vm0, %v49_v5  ;;  %247 = vmatprep.mubr.msk.f32.mxu1 %vm57_vm0, %v51_v7  ;;  %v50_v8 = vld [vmem:[%s317_s0 + $0x8] sm:$0xff]  ;;  %v52_v9 = vld [vmem:[%s317_s0 + $0x18] sm:$0xff] }
   0x4   :  { %251 = vmatprep.subr.bf16.mxu0 %v250_v3  ;;  %258 = vmatprep.subr.bf16.mxu1 %v250_v3 }
   0x5   :  { %253 = vmatpush3.bf16.msra.mxu0 %v250_v3  ;;  %260 = vmatpush3.bf16.msra.mxu1 %v250_v3 }
   0x6   :  { %255 = vmatprep.subr.bf16.mxu0 %v254_v6  ;;  %259 = vmatprep.subr.bf16.mxu1 %v254_v6 }
   0x8   :  { %v185_v27 = vld [vmem:[%s318_s2] sm:$0x1] }
   0x9   :  { %257 = vmatpush3.bf16.msra.mxu0 %v254_v6  ;;  %261 = vmatpush3.bf16.msra.mxu1 %v254_v6 }
   0xc   :  { %245 = vmatmul.mubr.msk.f32.vlgmr.msra.gmra.mrb[0].mxu0 %vm57_vm0, %v50_v8  ;;  %248 = vmatmul.mubr.msk.f32.vlgmr.msra.gmra.mrb[0].mxu1 %vm57_vm0, %v52_v9 }
  0xdf   :  { %v246_v11 = vpop.f32.mrb[0].mxu0  ;;  %v249_v12 = vpop.f32.mrb[0].mxu1 }
  0xe0   :  { %v187_v13 = vmul.f32 %v246_v11, %v246_v11  ;;  %v136_v14 = vpop.f32.mrb[1].mxu0  ;;  %v146_v15 = vpop.f32.mrb[1].mxu1  ;;  %v189_v19 = vmul.f32 %v249_v12, %v249_v12 }
  0xe1   :  { %v186_v16 = vmul.f32 %v136_v14, %v136_v14  ;;  %v188_v17 = vmul.f32 %v146_v15, %v146_v15 }
  0xe3   :  { %v190_v18 = vadd.f32 %v187_v13, %v186_v16 }
  0xe5   :  { %v191_v20 = vadd.f32 %v190_v18, %v188_v17 }
  0xe7   :  { %v192_v21 = vadd.f32 %v191_v20, %v189_v19 }
  0xe9   :  { %v193_v22 = vrot.slane %v192_v21, 4 }
  0xeb   :  { %v194_v23 = vadd.f32 %v193_v22, %v192_v21 }
  0xed   :  { %v195_v24 = vrot.slane %v194_v23, 2 }
  0xef   :  { %v196_v25 = vadd.f32 %v195_v24, %v194_v23 }
  0xf1   :  { %v197_v26 = vrot.slane %v196_v25, 1 }
  0xf3   :  { %v198_v28 = vadd.f32 %v197_v26, %v196_v25 }
  0xf5   :  { %v199_v29 = vadd.f32 %v198_v28, %v185_v27 }
  0xf7   :  { %200 = vst [vmem:[%s318_s2] sm:$0x1] %v199_v29 }

</bundles_post_ra>
